<compile_context>
chip_gen: v7x
topology: tpu7x:2x2x1
jax: 0.10.0
libtpu: 0.0.40
codegen_flags: <defaults>
</compile_context>

<pallas_src>
import math

import jax
import jax.numpy as jnp
from jax.experimental import pallas as pl
from jax.experimental.pallas import tpu as pltpu


def _cdiv(a, b):
    return -(-a // b)


def _device_gen():
    try:
        kind = jax.devices()[0].device_kind.lower()
    except Exception:
        return "other"
    for g in ("v7", "v6", "v5"):
        if g in kind:
            return g
    return "other"


_GEN = _device_gen()

# Per *input block* byte budget (amortizes ~0.35us/step grid overhead; conservative on
# v5e's 16 MiB default scoped VMEM, larger on v6e/v7x per the review).
_BLOCK_BYTE_BUDGET = {"v5": 3 << 20, "v6": 8 << 20, "v7": 7 << 20}.get(_GEN, 3 << 20)
# Explicit scoped-VMEM limit: floored at the per-gen default, capped well under the
# physical VMEM (64 MiB per core on v7x, 128 MiB elsewhere).
_VMEM_FLOOR = {"v5": 16 << 20, "v6": 32 << 20, "v7": 32 << 20}.get(_GEN, 16 << 20)
_VMEM_CAP = {"v5": 100 << 20, "v6": 100 << 20, "v7": 48 << 20}.get(_GEN, 48 << 20)
# >= 2 grid steps whenever splittable: feeds both v7x TensorCores and lets step-i read
# DMA overlap step-(i-1) write-back everywhere else.  Costs one ~0.35us step otherwise.
_MIN_GRID_STEPS = 2


def _compute_slices(chomp_sizes, nb_dims, spatial_shape):
    """Mirror Chomp.forward's (static, config-time) slice computation."""
    if nb_dims == 1:
        (L,) = spatial_shape
        return (slice(0, L - chomp_sizes[0]),)
    elif nb_dims == 2:
        H, W = spatial_shape
        if chomp_sizes[0] % 2 == 0:
            sh = slice(chomp_sizes[0] // 2, H - chomp_sizes[0] // 2)
        else:
            sh = slice(0, H - chomp_sizes[0])
        # Faithful to the original module: it indexes chomp_sizes[2] here even though
        # len(chomp_sizes) == 2 when nb_dims == 2, so this raises IndexError exactly
        # like the PyTorch code would (the 2D path never reaches a kernel).
        if chomp_sizes[2] % 2 == 0:
            sw = slice(chomp_sizes[1] // 2, W - chomp_sizes[1] // 2)
        else:
            sw = slice(0, W - chomp_sizes[1])
        return (sh, sw)
    elif nb_dims == 3:
        D, H, W = spatial_shape
        sd = slice(0, D - chomp_sizes[0])
        if chomp_sizes[1] % 2 == 0:
            sh = slice(chomp_sizes[1] // 2, H - chomp_sizes[1] // 2)
        else:
            sh = slice(0, H - chomp_sizes[1])
        if chomp_sizes[2] % 2 == 0:
            sw = slice(chomp_sizes[2] // 2, W - chomp_sizes[2] // 2)
        else:
            sw = slice(0, W - chomp_sizes[2])
        return (sd, sh, sw)
    else:
        raise RuntimeError("Invalid number of dims")


def _round_rows(t, total):
    """Legal row-block size for a dim sitting in the sublane slot:
    a multiple of 8, or the full extent."""
    t = int(max(1, min(t, total)))
    if t >= total or total <= 8:
        return total
    return max(8, (t // 8) * 8)


def _launch(kernel, xm, out_shape_m, grid, in_block, out_block, in_map, out_map):
    esize = xm.dtype.itemsize
    in_bytes = math.prod(in_block) * esize
    out_bytes = math.prod(out_block) * esize
    steps = math.prod(grid)
    # Double-buffered in + out blocks, plus headroom; clamp per generation.
    vmem_limit = int(min(_VMEM_CAP,
                         max(_VMEM_FLOOR, 2 * (in_bytes + out_bytes) + (2 << 20))))
    return pl.pallas_call(
        kernel,
        out_shape=jax.ShapeDtypeStruct(out_shape_m, xm.dtype),
        grid=grid,
        in_specs=[pl.BlockSpec(in_block, in_map)],
        out_specs=pl.BlockSpec(out_block, out_map),
        compiler_params=pltpu.CompilerParams(
            dimension_semantics=("parallel",) * len(grid),
            vmem_limit_bytes=vmem_limit,
        ),
        cost_estimate=pl.CostEstimate(
            flops=0,
            transcendentals=0,
            # What the DMA engines actually move: every input block (incl. H/W margins
            # and ragged padding) plus the written output.
            bytes_accessed=int(steps * in_bytes + math.prod(out_shape_m) * esize),
        ),
    )(xm)


class ChompPallas:
    """JAX/Pallas equivalent of the PyTorch Chomp module."""

    def __init__(self, chomp_sizes, nb_dims):
        if isinstance(chomp_sizes, int):
            self.chomp_sizes = [chomp_sizes] * nb_dims
        else:
            self.chomp_sizes = list(chomp_sizes)
        assert len(self.chomp_sizes) == nb_dims, "must enter a chomp size for each dim"
        self.nb_dims = nb_dims

    # ------------------------------------------------------------------ 1D
    def _build_1d(self, xm, NC, spatial, out_spatial, esize, budget):
        (L,) = spatial
        (L_out,) = out_spatial

        if L_out >= 128 or L * esize > budget:
            # Lane-blocked path: the chomp keeps a prefix of L, so input and output
            # share block indices.  tl is a multiple of 128 -> lane-dense, unmasked
            # stores; only <=127 elements of the chomped tail are ever read (raggedness).
            tl_cap = 128 * max(1, min(L // 128, _cdiv(L_out, 128)))
            tb = NC if NC <= 8 else 8
            tl = min(tl_cap, 128 * max(1, budget // (tb * 128 * esize)))
            if tl >= tl_cap:
                tl = tl_cap
                tb = _round_rows(budget // (tl * esize), NC)
            grid = (_cdiv(NC, tb), _cdiv(L_out, tl))
            if math.prod(grid) < _MIN_GRID_STEPS:
                if NC > 8:
                    tb = _round_rows(_cdiv(NC, 2), NC)
                elif L_out > 128:
                    tl = 128 * _cdiv(_cdiv(L_out, 128), 2)
                grid = (_cdiv(NC, tb), _cdiv(L_out, tl))

            def kernel(x_ref, o_ref):
                o_ref[...] = x_ref[...]

            blk = (tb, tl)
            return _launch(kernel, xm, (NC, L_out), grid, blk, blk,
                           lambda r, l: (r, l), lambda r, l: (r, l))

        # Short-L path: one full-L block per row-block, crop in VMEM.
        tb = _round_rows(budget // (L * esize), NC)
        if _cdiv(NC, tb) < _MIN_GRID_STEPS and NC > 8:
            tb = _round_rows(_cdiv(NC, 2), NC)
        grid = (_cdiv(NC, tb),)

        def kernel(x_ref, o_ref):
            o_ref[...] = x_ref[:, :L_out]

        return _launch(kernel, xm, (NC, L_out), grid,
                       (tb, L), (tb, L_out),
                       lambda r: (r, 0), lambda r: (r, 0))

    # ------------------------------------------------------------------ 3D
    def _build_3d(self, xm, NC, spatial, out_spatial, slices, esize, budget):
        D, H, W = spatial
        D_out, H_out, W_out = out_spatial
        h0, w0 = slices[1].start, slices[2].start
        HW = H * W

        if W_out == W:
            # No W crop: flatten (H, W) wrapper-side (free, contiguous) so the store's
            # last dim is H_out*W (lane-dense) and the H crop is a contiguous lane slice.
            xm = xm.reshape(NC, D, HW)
            lane0, lane_n = h0 * W, H_out * W
            out_shape_m = (NC, D_out, lane_n)
            row_bytes = HW * esize

            if D_out * row_bytes <= budget or D_out < 8:
                # Single d-block: exact extents keep both blocks' second-minor dim equal
                # to the full array dim (always legal) without 8-row padding.
                td_in, td_out = D, D_out
                tb = max(1, min(NC, budget // (D * row_bytes)))
                grid_d = 1
            else:
                td = 8 * max(1, min(D_out // 8, budget // (8 * row_bytes)))
                td_in = td_out = td
                tb = max(1, min(NC, budget // (td * row_bytes)))
                grid_d = _cdiv(D_out, td)

            if _cdiv(NC, tb) * grid_d < _MIN_GRID_STEPS:
                if NC >= 2:
                    tb = _cdiv(NC, 2)
                elif grid_d == 1 and D_out > 8:
                    td_in = td_out = 8 * _cdiv(_cdiv(D_out, 8), 2)
                    grid_d = _cdiv(D_out, td_out)
            grid_r = _cdiv(NC, tb)

            d_keep = td_out

            def kernel(x_ref, o_ref):
                o_ref[...] = x_ref[:, :d_keep, lane0:lane0 + lane_n]

            in_block = (tb, td_in, HW)
            out_block = (tb, td_out, lane_n)
        else:
            # General path (W crop present): keep natural (H, W) minor dims; the D chomp
            # is still skipped at the grid level so the D tail is never DMA'd.
            # TODO(synk): the (H_out, W_out) store stays lane-sparse here; a lane-dense
            # repack would need an in-VMEM reshape across the lane dim (or a strided
            # manual DMA with W_out-sized runs), neither of which is guaranteed to
            # lower / be efficient for small W_out.
            slab = HW * esize
            if D_out * slab <= budget:
                td = D_out
                tb = max(1, min(NC, budget // (D_out * slab)))
            else:
                tb = 1
                td = max(1, min(D_out, budget // slab))
            if _cdiv(NC, tb) * _cdiv(D_out, td) < _MIN_GRID_STEPS:
                if NC >= 2:
                    tb = _cdiv(NC, 2)
                elif D_out >= 2:
                    td = _cdiv(D_out, 2)
            grid_r, grid_d = _cdiv(NC, tb), _cdiv(D_out, td)
            out_shape_m = (NC, D_out, H_out, W_out)

            def kernel(x_ref, o_ref):
                o_ref[...] = x_ref[:, :, h0:h0 + H_out, w0:w0 + W_out]

            in_block = (tb, td, H, W)
            out_block = (tb, td, H_out, W_out)

        ndim = len(in_block)
        if grid_d == 1:
            # Drop the degenerate D grid axis (review: dead bookkeeping otherwise).
            grid = (grid_r,)
            in_map = out_map = (lambda r: (r,) + (0,) * (ndim - 1))
        else:
            grid = (grid_r, grid_d)
            in_map = out_map = (lambda r, d: (r, d) + (0,) * (ndim - 2))
        return _launch(kernel, xm, out_shape_m, grid, in_block, out_block, in_map, out_map)

    # ------------------------------------------------------------------ forward
    def __call__(self, x):
        N, C = int(x.shape[0]), int(x.shape[1])
        spatial = tuple(int(s) for s in x.shape[2:])
        assert len(spatial) == self.nb_dims, "input rank does not match nb_dims"

        # Faithful to the PyTorch module: nb_dims == 2 raises IndexError here
        # (chomp_sizes[2]); nb_dims not in {1,2,3} raises RuntimeError.
        slices = _compute_slices(self.chomp_sizes, self.nb_dims, spatial)
        out_spatial = tuple(s.stop - s.start for s in slices)
        if any(d <= 0 for d in out_spatial):
            raise ValueError(
                f"chomp sizes {self.chomp_sizes} leave no output for spatial shape {spatial}")

        NC = N * C
        esize = x.dtype.itemsize
        budget = _BLOCK_BYTE_BUDGET
        xm = x.reshape((NC,) + spatial)  # free: N, C are adjacent leading dims

        if self.nb_dims == 1:
            ym = self._build_1d(xm, NC, spatial, out_spatial, esize, budget)
        else:  # nb_dims == 3 (2D already raised above, as in the PyTorch module)
            ym = self._build_3d(xm, NC, spatial, out_spatial, slices, esize, budget)

        return ym.reshape((N, C) + out_spatial)


if __name__ == "__main__":
    key = jax.random.PRNGKey(0)

    # --- nb_dims == 1, short L, N*C = 15 (not a multiple of 8: exercises cdiv/ragged tiling)
    x1 = jax.random.normal(key, (3, 5, 16), dtype=jnp.float32)
    y1 = jax.block_until_ready(ChompPallas(3, 1)(x1))
    ref1 = x1[:, :, : 16 - 3]
    assert y1.shape == ref1.shape == (3, 5, 13)
    assert bool(jnp.all(y1 == ref1))

    # --- nb_dims == 1, long L (lane-blocked, lane-dense path)
    x1b = jax.random.normal(jax.random.fold_in(key, 1), (2, 4, 384), dtype=jnp.float32)
    y1b = jax.block_until_ready(ChompPallas(5, 1)(x1b))
    ref1b = x1b[:, :, : 384 - 5]
    assert y1b.shape == ref1b.shape == (2, 4, 379)
    assert bool(jnp.all(y1b == ref1b))

    # --- nb_dims == 3, mixed even/odd chomps incl. a W crop (general (H,W)-minor path)
    x3 = jax.random.normal(jax.random.fold_in(key, 3), (2, 4, 8, 9, 16), dtype=jnp.float32)
    y3 = jax.block_until_ready(ChompPallas((2, 3, 4), 3)(x3))
    # d: 0:6 ; h (odd 3): 0:6 ; w (even 4): 2:14
    ref3 = x3[:, :, 0:6, 0:6, 2:14]
    assert y3.shape == ref3.shape == (2, 4, 6, 6, 12)
    assert bool(jnp.all(y3 == ref3))

    # --- nb_dims == 3, no W crop (lane-dense flattened (H*W) path, offset H crop)
    x3b = jax.random.normal(jax.random.fold_in(key, 4), (2, 4, 8, 9, 16), dtype=jnp.float32)
    y3b = jax.block_until_ready(ChompPallas((2, 4, 0), 3)(x3b))
    # d: 0:6 ; h (even 4): 2:7 ; w (even 0): 0:16
    ref3b = x3b[:, :, 0:6, 2:7, :]
    assert y3b.shape == ref3b.shape == (2, 4, 6, 5, 16)
    assert bool(jnp.all(y3b == ref3b))

    # NOTE: the nb_dims == 2 path reproduces the original module's chomp_sizes[2]
    # indexing, which raises IndexError for any valid 2-dim config (exactly as the
    # PyTorch code would), so it never reaches a kernel.

    print("KERNEL_OK")
</pallas_src>

<mosaic_0001>
module attributes {stable_mosaic.version = 11 : i64} {
  func.func @kernel(%arg0: i32, %arg1: memref<8x16xf32, #tpu.memory_space<vmem>>, %arg2: memref<8x13xf32, #tpu.memory_space<vmem>>) attributes {dimension_semantics = [#tpu.dimension_semantics<parallel>], iteration_bounds = array<i64: 2>, scalar_prefetch = 0 : i64, scratch_operands = 0 : i64, tpu.core_type = #tpu.core_type<tc>, window_params = [{transform_indices = @transform_0, window_bounds = array<i64: 8, 16>}, {transform_indices = @transform_1, window_bounds = array<i64: 8, 13>}]} {
    %c0 = arith.constant 0 : index
    %c0_0 = arith.constant 0 : index
    %0 = vector.load %arg1[%c0, %c0_0] : memref<8x16xf32, #tpu.memory_space<vmem>>, vector<8x13xf32>
    %c0_1 = arith.constant 0 : index
    %c0_2 = arith.constant 0 : index
    %1 = vector.load %arg2[%c0_1, %c0_2] : memref<8x13xf32, #tpu.memory_space<vmem>>, vector<8x13xf32>
    tpu.vector_store %arg2[%c0_1, %c0_2], %0 {strides = array<i32>} : memref<8x13xf32, #tpu.memory_space<vmem>>, vector<8x13xf32>,
    return
  }
  func.func @transform_0(%arg0: i32) -> (i32, i32) {
    %c0_i32 = arith.constant 0 : i32
    %c0_i32_0 = arith.constant 0 : i32
    return %arg0, %c0_i32 : i32, i32
  }
  func.func @transform_1(%arg0: i32) -> (i32, i32) {
    %c0_i32 = arith.constant 0 : i32
    %c0_i32_0 = arith.constant 0 : i32
    return %arg0, %c0_i32 : i32, i32
  }
}

</mosaic_0001>

<bundles_post_ra>
// kernel: tpu_custom_call.1
= control target key start
LH: loop header
LB: loop body
LE: loop exit
PB: predicated region body
PF: predicated region fallthrough
CT: control target
= control target key end

     0   :  { %6 = vsyncpa [#allocation3], 0  ;;  %s548_s0 = inlined_call_operand.hbm [shape: f32[15,16], index: 0, kind: input, shape index: {}]   ;;  %s549_s1 = inlined_call_operand.hbm [shape: f32[15,13], index: 1, kind: output, shape index: {}]  }
   0x1   :  { %8 = vsyncpa [#allocation3 + $0x1], 0 }
   0x2   :  { %9 = vsyncpa [#allocation4], 0 }
   0x3   :  { %11 = vsyncpa [#allocation4 + $0x1], 0  ;;  %s387_s6 = smov 0   ;;  %s389_s7 = smov 0  }
   0x4   :  { %s391_s8 = smov 0   ;;  %s393_s9 = smov 0  }
   0x5 LB: > { %s408_s10 = sadd.s32 4294967295, %s373_s9   ;;  %s219_s11 = sadd.s32 4294967294, %s373_s9   ;;  %s373_s9 = sphi %s393_s9, %s564_s9   ;;  %s369_s8 = sphi %s391_s8, %s563_s8   ;;  %s365_s7 = sphi %s389_s7, %s562_s7   ;;  %s361_s6 = sphi %s387_s6, %s561_s6  }
   0x6   : > { %s412_s12 = sadd.s32 1, %s373_s9   ;;  %s24_s13 = sadd.s32 1, %s369_s8 }
   0x7   : > { %s21_s14 = ssub.s32 %s373_s9, %s412_s12  ;;  %p31_p0 = scmp.ne.s32.totalorder %s369_s8, %s365_s7 }
   0x8   : > { %p22_p1 = scmp.eq.s32.totalorder %s21_s14, 0  ;;  %p32_p2 = scmp.eq.s32.totalorder %s373_s9, 0 }
   0x9   : > { %p37_p3 = scmp.ne.s32.totalorder %s365_s7, %s361_s6  ;;  %p38_p4 = scmp.eq.s32.totalorder %s408_s10, 0 }
   0xa   : > { %s424_s15 = scalar_select %p22_p1, %s369_s8, %s24_s13  }
   0xb   : > { %p426_p5 = por %p32_p2, %p31_p0  ;;  %p430_p6 = por %p38_p4, %p37_p3 }
   0xc   : > { %p61_p7 = scmp.eq.s32.totalorder %s408_s10, 1  ;;  %p67_p8 = scmp.eq.s32.totalorder %s219_s11, 1 }
   0xd   : > { %p243_p10 = scmp.lt.s32.totalorder %s373_s9, 2  ;;  %s87_s20 = sand.u32 1, %s369_s8  }
   0xe   : > { %p437_p11 = por %p61_p7, %p31_p0  ;;  %p441_p12 = por %p67_p8, %p37_p3 }
   0xf   : > { %s223_s21 = sshll.u32 %s373_s9, 7  ;;  %s222_s22 = sshll.u32 %s87_s20, 3 }
  0x10   : > { %s553_s18 = scalar_select %p437_p11, 1, 0 }
  0x11   : > { %s554_s19 = scalar_select %p441_p12, 1, 0 }
  0x12   : > { %s450_s25 = scalar_lea.hbm %s548_s0, %s223_s21  ;;  %s91_s26 = scalar_lea.vmem [#allocation2], %s222_s22 }
  0x13   : > { %s98_s27 = sshll.u32 %s91_s26, 4  ;;  %p454_p13 = pnand %p243_p10, %p426_p5  ;;  %s458_s27 = int_to_ptr.vmem [resolvable:$true] %s98_s27 }
  0x14   : > { %s88_s29 = scalar_lea.sflag [#allocation3], %s87_s20  ;;  %s277_s30 = scalar_lea.hbm %s450_s25, 128 }
  0x15   : > { %p278_p2 = scmp.ne.s32.totalorder %s450_s25, %s277_s30  ;;  %p279_p3 = pneg %p454_p13 }
  0x16   : > { %s282_s4 = scalar_lea.hbm %s548_s0, 256  ;;  %p283_p5 = scmp.lt.u32.totalorder %s450_s25, %s548_s0 }
  0x17   : > { %p280_p4 = pnand %p279_p3, %p278_p2  ;;  %p284_p8 = scmp.lt.u32.totalorder %s282_s4, %s277_s30 }
  0x18   : > { %p286_p9 = scmp.lt.u32.totalorder %s277_s30, %s450_s25 }
  0x19   : > { %p281_p7 = pneg %p280_p4  ;;  %p285_p10 = por %p284_p8, %p283_p5 }
  0x1b   : > { %p287_p0 = por %p286_p9, %p285_p10 }
  0x1d   : > { %p288_p1 = pnand %p287_p0, %p281_p7 }
  0x1f   : > { %291 = shalt.err (!%p288_p1)
}
  0x20   : > { %s292_s13 = scalar_lea.vmem %s458_s27, 128  ;;  %s375_s14 = smov [#allocation2]  }
  0x21   : > { %p293_p2 = scmp.ne.s32.totalorder %s458_s27, %s292_s13  ;;  %s297_s16 = sshll.u32 %s375_s14, 4  ;;  %s298_s16 = int_to_ptr.vmem [resolvable:$false] %s297_s16 }
  0x22   : > { %s299_s20 = scalar_lea.vmem %s298_s16, 256  ;;  %p300_p11 = scmp.lt.s32.totalorder %s458_s27, %s298_s16 }
  0x23   : > { %p295_p4 = pnand %p293_p2, %p279_p3  ;;  %p301_p5 = scmp.lt.s32.totalorder %s299_s20, %s292_s13 }
  0x25   : > { %p296_p12 = pneg %p295_p4  ;;  %p302_p8 = por %p301_p5, %p300_p11 }
  0x27   : > { %p303_p9 = pnand %p302_p8, %p296_p12 }
  0x29   : > { %306 = shalt.err (!%p303_p9)
}
  0x2a   : > { %238 = dma.hbm_to_vmem [thread:$0]  (!%p454_p13), %s450_s25, 128, %s458_s27, %s88_s29  }
  0x2b   : > { %p556_p0 = scmp.lt.s32.totalorder %s373_s9, 3  ;;  %p557_p1 = scmp.ge.s32.totalorder %s373_s9, 1 }
  0x2d   : > { %p104_p3 = pnand %p557_p1, %p556_p0 }
  0x2e   : > { %s492_s21 = sand.u32 (!%p104_p3), 1, %s365_s7  }
  0x2f   : > { %107 = sbr.rel (%p104_p3) target bundleno = 81 (0x51), region = 24  ;;  %s225_s22 = sshll.u32 (!%p104_p3), %s492_s21, 3 }
  0x30   : > { %s110_s23 = scalar_lea.sflag (!%p104_p3), [#allocation3], %s492_s21  ;;  %s113_s24 = scalar_lea.vmem (!%p104_p3), [#allocation2], %s225_s22 }
  0x36   : > { %352 = dma.done.wait (%p430_p6), %s110_s23, 128  }
  0x37   : > { %354 = vsyncadd (%p430_p6), %s110_s23, 4294967168  ;;  %s131_s25 = scalar_lea.vmem [#allocation5], %s225_s22  ;;  %s228_s27 = sshll.u32 %s408_s10, 7  ;;  %vm133_vm0 = vcmask 105472   ;;  %v132_v0 = vld [vmem:[%s113_s24] sm:$0xff] }
  0x38   : > { %s149_s26 = sshll.u32 %s131_s25, 4  ;;  %s506_s30 = scalar_lea.hbm %s549_s1, %s228_s27  ;;  %134 = vst.msk [vmem:[%s131_s25] sm:$0xff] %vm133_vm0, %v132_v0  ;;  %s501_s26 = int_to_ptr.vmem [resolvable:$true] %s149_s26 }
  0x39   : > { %s136_s17 = scalar_lea.sflag [#allocation4], %s492_s21  ;;  %s307_s2 = scalar_lea.vmem %s501_s26, 128 }
  0x3a   : > { %p308_p6 = scmp.ne.s32.totalorder %s501_s26, %s307_s2  ;;  %p558_p11 = scmp.ne.s32.totalorder %s553_s18, 0 }
  0x3b   : > { %s376_s10 = smov [#allocation5]  }
  0x3c   : > { %p309_p12 = pnand %p308_p6, %p558_p11  ;;  %s311_s3 = sshll.u32 %s376_s10, 4  ;;  %s312_s3 = int_to_ptr.vmem [resolvable:$false] %s311_s3 }
  0x3d   : > { %s313_s4 = scalar_lea.vmem %s312_s3, 256  ;;  %p314_p7 = scmp.lt.s32.totalorder %s501_s26, %s312_s3 }
  0x3e   : > { %p310_p13 = pneg %p309_p12  ;;  %p315_p10 = scmp.lt.s32.totalorder %s313_s4, %s307_s2 }
  0x40   : > { %p316_p2 = por %p315_p10, %p314_p7 }
  0x42   : > { %p317_p4 = pnand %p316_p2, %p310_p13 }
  0x44   : > { %320 = shalt.err (!%p317_p4)
}
  0x45   : > { %s321_s5 = scalar_lea.hbm %s506_s30, 128  ;;  %s325_s14 = scalar_lea.hbm %s549_s1, 256 }
  0x46   : > { %p322_p5 = scmp.ne.s32.totalorder %s506_s30, %s321_s5  ;;  %p326_p0 = scmp.lt.u32.totalorder %s506_s30, %s549_s1 }
  0x47   : > { %p327_p1 = scmp.lt.u32.totalorder %s325_s14, %s321_s5  ;;  %p329_p6 = scmp.lt.u32.totalorder %s321_s5, %s506_s30 }
  0x48   : > { %p323_p8 = pnand %p322_p5, %p558_p11 }
  0x49   : > { %p328_p3 = por %p327_p1, %p326_p0 }
  0x4a   : > { %p324_p9 = pneg %p323_p8 }
  0x4b   : > { %p330_p12 = por %p329_p6, %p328_p3 }
  0x4d   : > { %p331_p13 = pnand %p330_p12, %p324_p9 }
  0x4f   : > { %334 = shalt.err (!%p331_p13)
}
  0x50   : > { %233 = dma.vmem_to_hbm [thread:$0]  (%p558_p11), %s501_s26, 128, %s506_s30, %s136_s17  }
  0x51 PF: > { %s161_s21 = sand.u32 1, %s361_s6   ;;  %p559_p7 = scmp.ne.s32.totalorder %s554_s19, 0 }
  0x52   : > { %p560_p10 = scmp.ge.s32.totalorder %s373_s9, 2  ;;  %s162_s22 = scalar_lea.sflag [#allocation4], %s161_s21 }
  0x54   : > { %p240_p2 = pnand %p560_p10, %p559_p7 }
  0x56   : > { %356 = dma.done.wait (!%p240_p2), %s162_s22, 128  }
  0x57   : > { %358 = vsyncadd (!%p240_p2), %s162_s22, 4294967168  ;;  %p14_p4 = scmp.ge.s32.totalorder %s412_s12, 4   ;;  %s561_s6 = smov %s365_s7 }
  0x58   : > { %s562_s7 = smov %s369_s8  ;;  %s563_s8 = smov %s424_s15 }
  0x59   : > { %s564_s9 = smov %s412_s12  ;;  %16 = sbr.rel (!%p14_p4) target bundleno = 5 (0x5), region = 69 }
  0x60   :  { %167 = vsyncpa [#allocation3], 1 }
  0x61   :  { %169 = vsyncpa [#allocation3 + $0x1], 1 }
  0x62   :  { %170 = vsyncpa [#allocation4], 1 }
  0x63   :  { %172 = vsyncpa [#allocation4 + $0x1], 1 }

</bundles_post_ra>
